<compile_context>
chip_gen: v7x
topology: tpu7x:2x2x1
jax: 0.10.0
libtpu: 0.0.40
codegen_flags: <defaults>
</compile_context>

<pallas_src>
import jax
import jax.numpy as jnp
from jax import lax
from jax.experimental import pallas as pl
from jax.experimental.pallas import tpu as pltpu


def same_kernel(wb_ref, wfeat_ref, feats_ref, attn_ref, out_ref):
    # wb_ref   : SMEM f32[2]      -> [w_attn, bias]
    # wfeat_ref: VMEM (1, C, 1)   -> per-feature-channel 1x1-conv weights
    # feats_ref: VMEM (N, C, HW)
    # attn_ref : VMEM (N, HW)
    # out_ref  : VMEM (N, HW)
    HW = feats_ref.shape[2]

    f = feats_ref[...]                                            # (N, C, HW)
    a = attn_ref[...]                                             # (N, HW)

    # --- argmax over batch-0 attention (first occurrence), computed once ---
    a0 = a[0:1, :]                                                # (1, HW)
    iota = lax.broadcasted_iota(jnp.int32, (1, HW), 1)            # (1, HW)
    m = jnp.max(a0, keepdims=True)                                # (1, 1)
    idx = jnp.min(jnp.where(a0 == m, iota, HW), keepdims=True)    # (1, 1)
    onehot = (iota == idx)[None]                                  # (1, 1, HW)

    # --- attended feature vector per (n, c), pre-scaled by its conv weight ---
    attended = jnp.sum(jnp.where(onehot, f, 0.0), axis=-1, keepdims=True)  # (N, C, 1)
    attended_w = attended * wfeat_ref[...]                        # (N, C, 1)

    # --- fused cross-correlation + 1x1 conv: sum_c w_c * attended_c * f_c ---
    acc = jnp.sum(f * attended_w, axis=1)                         # (N, HW) sublane reduce (XLU)
    acc = acc + wb_ref[0] * a + wb_ref[1]                         # + w_attn * attn + bias
    out_ref[...] = jax.nn.sigmoid(acc).astype(out_ref.dtype)


def same_module(feats, attn, weight, bias):
    """feats: (N, C, H, W), attn: (N, 1, H, W), weight: (C+1,), bias: scalar/(1,)."""
    N, C, H, W = feats.shape
    HW = H * W
    feats_f = feats.reshape(N, C, HW).astype(jnp.float32)
    attn_f = attn.reshape(N, HW).astype(jnp.float32)
    w = weight.reshape(-1).astype(jnp.float32)
    wfeat = w[:C].reshape(1, C, 1)                                # feature-channel weights
    wb = jnp.concatenate([w[C:C + 1], bias.reshape(-1).astype(jnp.float32)])  # [w_attn, bias]

    out = pl.pallas_call(
        same_kernel,
        out_shape=jax.ShapeDtypeStruct((N, HW), jnp.float32),
        in_specs=[
            pl.BlockSpec(memory_space=pltpu.MemorySpace.SMEM),    # [w_attn, bias]
            pl.BlockSpec(memory_space=pltpu.MemorySpace.VMEM),    # (1, C, 1) conv weights
            pl.BlockSpec(memory_space=pltpu.MemorySpace.VMEM),    # (N, C, HW) feats
            pl.BlockSpec(memory_space=pltpu.MemorySpace.VMEM),    # (N, HW) attn
        ],
        out_specs=pl.BlockSpec(memory_space=pltpu.MemorySpace.VMEM),
    )(wb, wfeat, feats_f, attn_f)
    return out.reshape(N, 1, H, W)


def same_module_ref(feats, attn, weight, bias):
    """Pure-JAX reference (mirrors the PyTorch forward)."""
    N, C, H, W = feats.shape
    idx = jnp.argmax(attn[0, 0].reshape(-1))
    r, c = idx // W, idx % W
    attended = feats[:, :, r, c][:, :, None, None]                # (N, C, 1, 1)
    x = feats * attended
    x = jnp.concatenate([x, attn], axis=1)                        # (N, C+1, H, W)
    logits = jnp.einsum("nchw,c->nhw", x, weight) + bias
    return jax.nn.sigmoid(logits)[:, None]                        # (N, 1, H, W)


if __name__ == "__main__":
    key = jax.random.PRNGKey(0)
    k_feats, k_attn, k_w, k_b = jax.random.split(key, 4)

    N, dim, H, W = 2, 4, 16, 16
    feats = jax.random.normal(k_feats, (N, dim, H, W), dtype=jnp.float32)
    attn = jax.random.normal(k_attn, (N, 1, H, W), dtype=jnp.float32)

    # Conv2d(dim + 1, 1, kernel_size=1): weight (1, dim+1, 1, 1) kaiming-normal, bias uniform.
    fan_in = dim + 1
    weight = jax.random.normal(k_w, (fan_in,), dtype=jnp.float32) * jnp.sqrt(2.0 / fan_in)
    bound = 1.0 / jnp.sqrt(fan_in)
    bias = jax.random.uniform(k_b, (1,), minval=-bound, maxval=bound, dtype=jnp.float32)

    out = jax.block_until_ready(same_module(feats, attn, weight, bias))
    ref = same_module_ref(feats, attn, weight, bias)

    assert out.shape == (N, 1, H, W)
    assert jnp.allclose(out, ref, atol=1e-5, rtol=1e-5)
    print("KERNEL_OK")
</pallas_src>

<mosaic_0001>
module attributes {stable_mosaic.version = 11 : i64} {
  func.func @same_kernel(%arg0: memref<2xf32, #tpu.memory_space<smem>>, %arg1: memref<1x4x1xf32, #tpu.memory_space<vmem>>, %arg2: memref<2x4x256xf32, #tpu.memory_space<vmem>>, %arg3: memref<2x256xf32, #tpu.memory_space<vmem>>, %arg4: memref<2x256xf32, #tpu.memory_space<vmem>>) attributes {dimension_semantics = [], scalar_prefetch = 0 : i64, scratch_operands = 0 : i64, tpu.core_type = #tpu.core_type<tc>} {
    %c0 = arith.constant 0 : index
    %c0_0 = arith.constant 0 : index
    %c0_1 = arith.constant 0 : index
    %0 = vector.load %arg2[%c0, %c0_0, %c0_1] : memref<2x4x256xf32, #tpu.memory_space<vmem>>, vector<2x4x256xf32>
    %c0_2 = arith.constant 0 : index
    %c0_3 = arith.constant 0 : index
    %1 = vector.load %arg3[%c0_2, %c0_3] : memref<2x256xf32, #tpu.memory_space<vmem>>, vector<2x256xf32>
    %2 = vector.extract_strided_slice %1 {offsets = [0, 0], sizes = [1, 256], strides = [1, 1]} : vector<2x256xf32> to vector<1x256xf32>
    %3 = tpu.iota {dimensions = array<i32: 1>} : vector<1x256xi32>
    %4 = vector.shape_cast %2 : vector<1x256xf32> to vector<1x1x256xf32>
    %cst = arith.constant dense<0xFF800000> : vector<1xf32>
    %5 = vector.multi_reduction <maximumf>, %4, %cst [1, 2] : vector<1x1x256xf32> to vector<1xf32>
    %6 = vector.shape_cast %5 : vector<1xf32> to vector<1x1x1xf32>
    %7 = vector.extract %6[0, 0, 0] : f32 from vector<1x1x1xf32>
    %8 = vector.broadcast %7 : f32 to vector<1x1xf32>
    %9 = vector.broadcast %8 : vector<1x1xf32> to vector<1x256xf32>
    %10 = arith.cmpf oeq, %2, %9 : vector<1x256xf32>
    %c256_i32 = arith.constant 256 : i32
    %11 = vector.broadcast %c256_i32 : i32 to vector<1x256xi32>
    %12 = arith.select %10, %3, %11 : vector<1x256xi1>, vector<1x256xi32>
    %13 = vector.shape_cast %12 : vector<1x256xi32> to vector<1x1x256xi32>
    %cst_4 = arith.constant dense<2147483647> : vector<1xi32>
    %14 = vector.multi_reduction <minsi>, %13, %cst_4 [1, 2] : vector<1x1x256xi32> to vector<1xi32>
    %15 = vector.shape_cast %14 : vector<1xi32> to vector<1x1x1xi32>
    %16 = vector.extract %15[0, 0, 0] : i32 from vector<1x1x1xi32>
    %17 = vector.broadcast %16 : i32 to vector<1x1xi32>
    %18 = vector.broadcast %17 : vector<1x1xi32> to vector<1x256xi32>
    %19 = arith.cmpi eq, %3, %18 : vector<1x256xi32>
    %20 = vector.shape_cast %19 : vector<1x256xi1> to vector<1x1x256xi1>
    %cst_5 = arith.constant 0.000000e+00 : f32
    %21 = vector.shape_cast %20 : vector<1x1x256xi1> to vector<1x1x256xi1>
    %22 = vector.broadcast %21 : vector<1x1x256xi1> to vector<2x4x256xi1>
    %23 = vector.broadcast %cst_5 : f32 to vector<2x4x256xf32>
    %24 = arith.select %22, %0, %23 : vector<2x4x256xi1>, vector<2x4x256xf32>
    %cst_6 = arith.constant dense<0.000000e+00> : vector<2x4xf32>
    %25 = vector.multi_reduction <add>, %24, %cst_6 [2] : vector<2x4x256xf32> to vector<2x4xf32>
    %26 = vector.shape_cast %25 : vector<2x4xf32> to vector<2x4x1xf32>
    %c0_7 = arith.constant 0 : index
    %c0_8 = arith.constant 0 : index
    %c0_9 = arith.constant 0 : index
    %27 = vector.load %arg1[%c0_7, %c0_8, %c0_9] : memref<1x4x1xf32, #tpu.memory_space<vmem>>, vector<1x4x1xf32>
    %28 = vector.broadcast %27 : vector<1x4x1xf32> to vector<2x4x1xf32>
    %29 = arith.mulf %26, %28 : vector<2x4x1xf32>
    %30 = vector.broadcast %29 : vector<2x4x1xf32> to vector<2x4x256xf32>
    %31 = arith.mulf %0, %30 : vector<2x4x256xf32>
    %cst_10 = arith.constant dense<0.000000e+00> : vector<2x256xf32>
    %32 = vector.multi_reduction <add>, %31, %cst_10 [1] : vector<2x4x256xf32> to vector<2x256xf32>
    %c0_11 = arith.constant 0 : index
    %33 = memref.load %arg0[%c0_11] : memref<2xf32, #tpu.memory_space<smem>>
    %34 = vector.broadcast %33 : f32 to vector<2x256xf32>
    %35 = arith.mulf %34, %1 : vector<2x256xf32>
    %36 = arith.addf %32, %35 : vector<2x256xf32>
    %c1 = arith.constant 1 : index
    %37 = memref.load %arg0[%c1] : memref<2xf32, #tpu.memory_space<smem>>
    %38 = vector.broadcast %37 : f32 to vector<2x256xf32>
    %39 = arith.addf %36, %38 : vector<2x256xf32>
    %40 = arith.negf %39 : vector<2x256xf32>
    %41 = math.exp %40 : vector<2x256xf32>
    %cst_12 = arith.constant 1.000000e+00 : f32
    %42 = vector.broadcast %cst_12 : f32 to vector<2x256xf32>
    %43 = arith.addf %42, %41 : vector<2x256xf32>
    %44 = arith.divf %42, %43 : vector<2x256xf32>
    %c0_13 = arith.constant 0 : index
    %c0_14 = arith.constant 0 : index
    %45 = vector.load %arg4[%c0_13, %c0_14] : memref<2x256xf32, #tpu.memory_space<vmem>>, vector<2x256xf32>
    tpu.vector_store %arg4[%c0_13, %c0_14], %44 {strides = array<i32>} : memref<2x256xf32, #tpu.memory_space<vmem>>, vector<2x256xf32>,
    return
  }
}

</mosaic_0001>

<bundles_post_ra>
// kernel: tpu_custom_call.1
= control target key start
LH: loop header
LB: loop body
LE: loop exit
PB: predicated region body
PF: predicated region fallthrough
CT: control target
= control target key end

     0   :  { %9 = vsyncpa [#allocation5], 0  ;;  %s511_s0 = inlined_call_operand.vmem [shape: f32[2], index: 0, kind: input, shape index: {}]   ;;  %s512_s1 = inlined_call_operand.vmem [shape: f32[1,4,1], index: 1, kind: input, shape index: {}]   ;;  %s513_s2 = inlined_call_operand.hbm [shape: f32[2,4,256], index: 2, kind: input, shape index: {}]   ;;  %s514_s3 = inlined_call_operand.vmem [shape: f32[2,256], index: 3, kind: input, shape index: {}]   ;;  %s515_s4 = inlined_call_operand.hbm [shape: f32[2,256], index: 4, kind: output, shape index: {}]  }
   0x1   :  { %10 = vsyncpa [#allocation3], 0 }
   0x2   :  { %11 = vsyncpa [#allocation4], 0  ;;  %s18_s17 = sshll.u32 %s511_s0, 4  ;;  %s19_s17 = int_to_ptr.vmem [resolvable:$true] %s18_s17 }
   0x3   :  { %s353_s18 = scalar_lea.vmem %s19_s17, 16  ;;  %p358_p1 = scmp.lt.s32.totalorder %s19_s17, %s19_s17 }
   0x4   :  { %p354_p0 = scmp.ne.s32.totalorder %s19_s17, %s353_s18  ;;  %p359_p2 = scmp.lt.s32.totalorder %s353_s18, %s353_s18 }
   0x6   :  { %p360_p3 = por %p359_p2, %p358_p1 }
   0x8   :  { %p361_p4 = pnand %p360_p3, %p354_p0 }
   0xa   :  { %364 = shalt.err (!%p361_p4)
}
   0xb   :  { %s415_s19 = smov [#allocation2]   ;;  %s416_s20 = smov [#allocation6]  }
   0xc   :  { %21 = dma.vmem_to_smem %s19_s17, 16, %s415_s19, [#allocation5]  }
   0xd   :  { %s29_s21 = sshll.u32 %s416_s20, 4  ;;  %s365_s24 = scalar_lea.hbm %s513_s2, 256  ;;  %s30_s21 = int_to_ptr.vmem [resolvable:$true] %s29_s21 }
   0xe   :  { %p366_p5 = scmp.ne.s32.totalorder %s513_s2, %s365_s24  ;;  %p369_p6 = scmp.lt.u32.totalorder %s365_s24, %s513_s2 }
  0x10   :  { %p371_p7 = pnand %p369_p6, %p366_p5 }
  0x12   :  { %374 = shalt.err (!%p371_p7)
}
  0x13   :  { %s375_s28 = scalar_lea.vmem %s30_s21, 256  ;;  %p380_p9 = scmp.lt.s32.totalorder %s30_s21, %s30_s21 }
  0x14   :  { %p376_p8 = scmp.ne.s32.totalorder %s30_s21, %s375_s28  ;;  %p381_p10 = scmp.lt.s32.totalorder %s375_s28, %s375_s28 }
  0x16   :  { %p382_p11 = por %p381_p10, %p380_p9 }
  0x18   :  { %p383_p12 = pnand %p382_p11, %p376_p8 }
  0x1a   :  { %386 = shalt.err (!%p383_p12)
}
  0x1b   :  { %s417_s29 = smov 128   ;;  %s418_s30 = smov 8  }
  0x1c   :  { %35 = dma.hbm_to_vmem [thread:$0]  %s513_s2, 256, %s30_s21, [#allocation3], %s417_s29, %s417_s29, %s418_s30  }
  0x1d   :  { %409 = dma.done.wait [#allocation5], 16  }
  0x1e   :  { %410 = vsyncadd [#allocation5], 4294967280 }
  0x1f   :  { %411 = dma.done.wait [#allocation3], 256  }
  0x20   :  { %412 = vsyncadd [#allocation3], 4294967040 }
  0x21   :  { %44 = sfence }
  0x22   :  { %v48_v0 = vlaneseq  ;;  %v468_v2 = vld [vmem:[%s514_s3] sm:$0xf]  ;;  %vm62_vm0 = vcmask 1040384   ;;  %v419_v18 = vmov 1983009808   ;;  %v46_v50 = vld [vmem:[#allocation6 + $0x8] sm:$0xff] }
  0x23   :  { %v79_v19 = vunpack.c.l.s4 %v419_v18  ;;  %v45_v49 = vld [vmem:[#allocation6] sm:$0xff]  ;;  %v132_v52 = vcombine.high %v46_v50, %v46_v50  ;;  %vm139_vm7 = vcmask 1043456   ;;  %s213_s11 = sld [smem:[#allocation2]]  ;;  %vm290_vm10 = vcmask 1041409   ;;  %s422_s12 = smov [#allocation7]  }
  0x24   :  { %v463_v1 = vshrl.u32 %v48_v0, 7  ;;  %v49_v17 = vand.u32 127, %v48_v0  ;;  %v131_v51 = vcombine.high %v45_v49, %v45_v49  ;;  %v420_v0 = vmov 0   ;;  %s306_s13 = sshll.u32 %s422_s12, 4  ;;  %s307_s13 = int_to_ptr.vmem [resolvable:$true] %s306_s13 }
  0x25   :  { %v80_v21 = vunpack.c.0.s8 %v79_v19  ;;  %334 = vset.pattern.permute.xlu0 %v420_v0  ;;  %333 = vset.pattern.permute.xlu1 %v420_v0  ;;  %vm292_vm11 = vcmask 1043459   ;;  %vm294_vm12 = vcmask 1045509   ;;  %vm296_vm13 = vcmask 1047559   ;;  %s387_s14 = scalar_lea.vmem %s307_s13, 64  ;;  %p392_p0 = scmp.lt.s32.totalorder %s307_s13, %s307_s13 }
  0x26   :  { %v54_v3 = vsub.s32 0, %v463_v1  ;;  %v58_v4 = vsub.s32 2, %v463_v1  ;;  %v50_v20 = vadd.s32 128, %v49_v17  ;;  %p388_p13 = scmp.ne.s32.totalorder %s307_s13, %s387_s14  ;;  %p393_p1 = scmp.lt.s32.totalorder %s387_s14, %s387_s14 }
  0x27   :  { %v477_v23 = vsub.s32 %v80_v21, %v463_v1 }
  0x28   :  { %v55_v5 = vrot.slane %v468_v2, %v54_v3  ;;  %v59_v6 = vrot.slane %v468_v2, %v58_v4  ;;  %v77_v22 = vcombine.low %v49_v17, %v50_v20  ;;  %p394_p2 = por %p393_p1, %p392_p0 }
  0x2a   :  { %v63_v7 = vsel %vm62_vm0, %v55_v5, -inf  ;;  %v64_v8 = vsel %vm62_vm0, %v59_v6, -inf  ;;  %v84_v24 = vrot.slane %v77_v22, %v477_v23  ;;  %p395_p3 = pnand %p394_p2, %p388_p13 }
  0x2b   :  { %v65_v9 = vmax.f32 %v63_v7, %v64_v8  ;;  %v421_v8 = vmov 839922192  }
  0x2d   :  { %66 = vmax.xlane.f32.xlu0 %v65_v9  ;;  %v162_v9 = vunpack.c.l.s4 %v421_v8 }
  0xba   :  { %v67_v10 = vpop.xlane.xlu0 %66 }
  0xbb   :  { %v68_v11 = vrot.slane %v67_v10, 4 }
  0xbd   :  { %v69_v12 = vmax.f32 %v67_v10, %v68_v11  ;;  %v163_v10 = vunpack.c.0.s8 %v162_v9 }
  0xbf   :  { %v70_v13 = vrot.slane %v69_v12, 2  ;;  %v166_v11 = vsub.s32 %v163_v10, %v463_v1 }
  0xc1   :  { %v71_v14 = vmax.f32 %v69_v12, %v70_v13  ;;  %v214_v12 = vstv %s213_s11 }
  0xc3   :  { %v72_v15 = vrot.slane %v71_v14, 1 }
  0xc5   :  { %v73_v16 = vmax.f32 %v71_v14, %v72_v15 }
  0xc7   :  { %321 = vpush %v73_v16 }
  0xf8   :  { %s322_s2 = spop %321 }
  0xf9   :  { %v75_v25 = vstv %s322_s2 }
  0xfa   :  { %vm76_vm1 = vcmp.eq.f32.partialorder %v468_v2, %v75_v25 }
  0xfb   :  { %v85_v26 = vsel %vm76_vm1, %v84_v24, 256 }
  0xfc   :  { %v89_v27 = vrot.slane %v85_v26, %v54_v3  ;;  %v93_v28 = vrot.slane %v85_v26, %v58_v4  ;;  %v150_v3 = vld [vmem:[%s512_s1] sm:$0xf]  ;;  %s316_s1 = sld [smem:[#allocation2 + $0x1]] }
  0xfe   :  { %v94_v29 = vsel %vm62_vm0, %v89_v27, 2147483647  ;;  %v95_v30 = vsel %vm62_vm0, %v93_v28, 2147483647 }
  0xff   :  { %vm96_vm2 = vcmp.lt.s32.totalorder %v94_v29, %v95_v30 }
 0x100   :  { %v97_v31 = vsel %vm96_vm2, %v94_v29, %v95_v30 }
 0x101   :  { %v99_v32 = vshra.s32 %v97_v31, 16  ;;  %v98_v34 = vand.u32 65535, %v97_v31 }
 0x103   :  { %v101_v33 = vcvt.s32.f32 %v99_v32  ;;  %v100_v36 = vcvt.s32.f32 %v98_v34 }
 0x105   :  { %102 = vmin.xlane.f32.xlu0 %v101_v33 }
 0x192   :  { %v103_v35 = vpop.xlane.xlu0 %102 }
 0x193   :  { %vm104_vm3 = vcmp.eq.f32.partialorder %v101_v33, %v103_v35  ;;  %v109_v38 = vcvt.f32.s32 %v103_v35 }
 0x194   :  { %v105_v37 = vsel %vm104_vm3, %v100_v36, inf }
 0x195   :  { %106 = vmin.xlane.f32.xlu1 %v105_v37  ;;  %v110_v40 = vshll.u32 %v109_v38, 16 }
 0x222   :  { %v107_v39 = vpop.xlane.xlu1 %106 }
 0x223   :  { %v108_v41 = vcvt.f32.s32 %v107_v39 }
 0x225   :  { %v111_v42 = vadd.s32 %v110_v40, %v108_v41 }
 0x227   :  { %v112_v43 = vrot.slane %v111_v42, 4 }
 0x229   :  { %vm113_vm4 = vcmp.lt.s32.totalorder %v111_v42, %v112_v43 }
 0x22a   :  { %v114_v44 = vsel %vm113_vm4, %v111_v42, %v112_v43 }
 0x22b   :  { %v115_v45 = vrot.slane %v114_v44, 2 }
 0x22d   :  { %vm116_vm5 = vcmp.lt.s32.totalorder %v114_v44, %v115_v45 }
 0x22e   :  { %v117_v46 = vsel %vm116_vm5, %v114_v44, %v115_v45 }
 0x22f   :  { %v118_v47 = vrot.slane %v117_v46, 1 }
 0x231   :  { %vm119_vm6 = vcmp.lt.s32.totalorder %v117_v46, %v118_v47 }
 0x232   :  { %v120_v48 = vsel %vm119_vm6, %v117_v46, %v118_v47 }
 0x233   :  { %323 = vpush %v120_v48 }
 0x264   :  { %s324_s3 = spop %323 }
 0x265   :  { %v122_v53 = vstv %s324_s3 }
 0x266   :  { %vm123_vm8 = vcmp.eq.s32.totalorder %v49_v17, %v122_v53  ;;  %vm124_vm9 = vcmp.eq.s32.totalorder %v50_v20, %v122_v53  ;;  %v215_v17 = vmul.f32 %v214_v12, %v468_v2 }
 0x267   :  { %v135_v54 = vsel %vm123_vm8, %v45_v49, 0.0  ;;  %v136_v55 = vsel %vm124_vm9, %v131_v51, 0.0  ;;  %v137_v56 = vsel %vm123_vm8, %v46_v50, 0.0  ;;  %v138_v57 = vsel %vm124_vm9, %v132_v52, 0.0 }
 0x268   :  { %v145_v58 = vsel %vm139_vm7, %v137_v56, 0.0  ;;  %v146_v59 = vsel %vm139_vm7, %v138_v57, 0.0  ;;  %v140_v60 = vsel %vm139_vm7, %v135_v54, 0.0  ;;  %v141_v61 = vsel %vm139_vm7, %v136_v55, 0.0 }
 0x269   :  { %v147_v62 = vadd.f32 %v146_v59, %v145_v58  ;;  %v142_v63 = vadd.f32 %v141_v61, %v140_v60  ;;  %v223_v27 = vrot.slane %v215_v17, %v477_v23  ;;  %v236_v51 = vstv %s316_s1 }
 0x26b   :  { %148 = vadd.xlane.f32.xlu1 %v147_v62  ;;  %143 = vadd.xlane.f32.xlu0 %v142_v63  ;;  %v224_v36 = vcombine.high %v223_v27, %v223_v27  ;;  %v225_v41 = vrot.slane %v223_v27, 1 }
 0x26d   :  { %v226_v46 = vrot.slane %v224_v36, 1 }
 0x2f8   :  { %v149_v4 = vpop.xlane.xlu1 %148  ;;  %v144_v5 = vpop.xlane.xlu0 %143 }
 0x2f9   :  { %v152_v6 = vmul.f32 %v150_v3, %v149_v4  ;;  %v151_v7 = vmul.f32 %v150_v3, %v144_v5 }
 0x2fb   :  { %159 = vperm.xlu1 %333, %v152_v6   ;;  %155 = vperm.xlu0 %334, %v151_v7  }
 0x37a   :  { %v160_v13 = vpop.permute.xlu1 %159  ;;  %v156_v14 = vpop.permute.xlu0 %155 }
 0x37b   :  { %v174_v15 = vrot.slane %v160_v13, %v166_v11  ;;  %v167_v16 = vrot.slane %v156_v14, %v166_v11 }
 0x37d   :  { %v178_v18 = vmul.f32 %v174_v15, %v46_v50  ;;  %v177_v19 = vmul.f32 %v167_v16, %v45_v49 }
 0x37f   :  { %v182_v20 = vcombine.high %v178_v18, %v178_v18  ;;  %v199_v21 = vsel %vm139_vm7, %v178_v18, 0.0  ;;  %v181_v22 = vcombine.high %v177_v19, %v177_v19  ;;  %v185_v24 = vsel %vm139_vm7, %v177_v19, 0.0 }
 0x380   :  { %v200_v25 = vrot.slane %v199_v21, 4  ;;  %v186_v26 = vrot.slane %v185_v24, 4 }
 0x381   :  { %v206_v1 = vsel %vm139_vm7, %v182_v20, 0.0  ;;  %v192_v28 = vsel %vm139_vm7, %v181_v22, 0.0 }
 0x382   :  { %v201_v29 = vadd.f32 %v200_v25, %v199_v21  ;;  %v207_v30 = vrot.slane %v206_v1, 4  ;;  %v187_v31 = vadd.f32 %v186_v26, %v185_v24  ;;  %v193_v2 = vrot.slane %v192_v28, 4 }
 0x384   :  { %v202_v32 = vrot.slane %v201_v29, 2  ;;  %v208_v33 = vadd.f32 %v207_v30, %v206_v1  ;;  %v188_v34 = vrot.slane %v187_v31, 2  ;;  %v194_v35 = vadd.f32 %v193_v2, %v192_v28 }
 0x386   :  { %v203_v37 = vadd.f32 %v202_v32, %v201_v29  ;;  %v209_v38 = vrot.slane %v208_v33, 2  ;;  %v189_v39 = vadd.f32 %v188_v34, %v187_v31  ;;  %v195_v40 = vrot.slane %v194_v35, 2 }
 0x388   :  { %v204_v42 = vrot.slane %v203_v37, 1  ;;  %v210_v43 = vadd.f32 %v209_v38, %v208_v33  ;;  %v190_v44 = vrot.slane %v189_v39, 1  ;;  %v196_v45 = vadd.f32 %v195_v40, %v194_v35 }
 0x38a   :  { %v205_v47 = vadd.f32 %v204_v42, %v203_v37  ;;  %v211_v48 = vrot.slane %v210_v43, 1  ;;  %v191_v49 = vadd.f32 %v190_v44, %v189_v39  ;;  %v197_v50 = vrot.slane %v196_v45, 1 }
 0x38c   :  { %v212_v52 = vadd.f32 %v211_v48, %v210_v43  ;;  %v233_v53 = vadd.f32 %v225_v41, %v205_v47  ;;  %v198_v54 = vadd.f32 %v197_v50, %v196_v45  ;;  %v231_v55 = vadd.f32 %v223_v27, %v191_v49 }
 0x38e   :  { %v234_v56 = vadd.f32 %v226_v46, %v212_v52  ;;  %v239_v57 = vadd.f32 %v236_v51, %v233_v53  ;;  %v232_v58 = vadd.f32 %v224_v36, %v198_v54  ;;  %v237_v59 = vadd.f32 %v236_v51, %v231_v55 }
 0x390   :  { %v240_v60 = vadd.f32 %v236_v51, %v234_v56  ;;  %v319_v61 = vmul.f32 -1.442695, %v239_v57  ;;  %v238_v62 = vadd.f32 %v236_v51, %v232_v58  ;;  %v317_v63 = vmul.f32 -1.442695, %v237_v59 }
 0x392   :  { %337 = vpow2.f32 %v319_v61  ;;  %v320_v0 = vmul.f32 -1.442695, %v240_v60  ;;  %v318_v3 = vmul.f32 -1.442695, %v238_v62 }
 0x393   :  { %339 = vpow2.f32 %v317_v63 }
 0x394   :  { %341 = vpow2.f32 %v320_v0 }
 0x395   :  { %343 = vpow2.f32 %v318_v3 }
 0x39c   :  { %v338_v4 = vpop.eup %337 }
 0x39d   :  { %v340_v5 = vpop.eup %339  ;;  %v255_v6 = vadd.f32 1.0, %v338_v4 }
 0x39e   :  { %v342_v7 = vpop.eup %341  ;;  %v253_v8 = vadd.f32 1.0, %v340_v5 }
 0x39f   :  { %v344_v9 = vpop.eup %343  ;;  %v256_v10 = vadd.f32 1.0, %v342_v7  ;;  %345 = vrcp.f32 %v255_v6 }
 0x3a0   :  { %v254_v11 = vadd.f32 1.0, %v344_v9  ;;  %347 = vrcp.f32 %v253_v8 }
 0x3a1   :  { %349 = vrcp.f32 %v256_v10 }
 0x3a2   :  { %351 = vrcp.f32 %v254_v11 }
 0x3a9   :  { %v346_v12 = vpop.eup %345 }
 0x3aa   :  { %v348_v13 = vpop.eup %347 }
 0x3ab   :  { %v350_v14 = vpop.eup %349 }
 0x3ac   :  { %v352_v15 = vpop.eup %351  ;;  %v277_v16 = vcombine.low %v346_v12, %v350_v14 }
 0x3ad   :  { %v269_v17 = vcombine.low %v348_v13, %v352_v15 }
 0x3ae   :  { %v284_v18 = vrot.slane %v277_v16, %v477_v23 }
 0x3af   :  { %v276_v19 = vrot.slane %v269_v17, %v477_v23 }
 0x3b0   :  { %v289_v20 = vrot.slane %v284_v18, 7 }
 0x3b2   :  { %v291_v21 = vsel %vm290_vm10, %v289_v20, %v276_v19 }
 0x3b3   :  { %v293_v22 = vsel %vm292_vm11, %v289_v20, %v291_v21 }
 0x3b4   :  { %v295_v24 = vsel %vm294_vm12, %v289_v20, %v293_v22 }
 0x3b5   :  { %v297_v25 = vsel %vm296_vm13, %v289_v20, %v295_v24 }
 0x3b6   :  { %299 = vst [vmem:[#allocation7] sm:$0xf] %v297_v25 }
 0x3b7   :  { %398 = shalt.err (!%p395_p3)
}
 0x3b8   :  { %s399_s17 = scalar_lea.hbm %s515_s4, 64 }
 0x3b9   :  { %p400_p4 = scmp.ne.s32.totalorder %s515_s4, %s399_s17  ;;  %p403_p5 = scmp.lt.u32.totalorder %s399_s17, %s515_s4 }
 0x3bb   :  { %p405_p6 = pnand %p403_p5, %p400_p4 }
 0x3bd   :  { %408 = shalt.err (!%p405_p6)
}
 0x3be   :  { %309 = dma.vmem_to_hbm [thread:$0]  %s307_s13, 64, %s515_s4, [#allocation4]  }
 0x3bf   :  { %413 = dma.done.wait [#allocation4], 64  }
 0x3c0   :  { %414 = vsyncadd [#allocation4], 4294967232 }
 0x3c1   :  { %313 = vsyncpa [#allocation3], 1 }
 0x3c2   :  { %314 = vsyncpa [#allocation4], 1 }
 0x3c3   :  { %315 = vsyncpa [#allocation5], 1 }

</bundles_post_ra>
